<compile_context>
chip_gen: v7x
topology: tpu7x:2x2x1
jax: 0.10.0
libtpu: 0.0.40
codegen_flags: <defaults>
</compile_context>

<pallas_src>
import functools

import jax
import jax.numpy as jnp
from jax.experimental import pallas as pl
from jax.experimental.pallas import tpu as pltpu


def _round_up(x, m):
    return ((x + m - 1) // m) * m


def _proj_kernel(x_ref, w_ref, b_ref, o_ref):
    # x_ref: (tile_m, K) patch rows        (streamed)
    # w_ref: (K, E)      projection weight (resident)
    # b_ref: (1, E)      float32 bias      (resident)
    # o_ref: (tile_m, E) tokens
    acc = jnp.dot(x_ref[...], w_ref[...], preferred_element_type=jnp.float32)
    o_ref[...] = (acc + b_ref[...]).astype(o_ref.dtype)


def _proj_matmul(patches, w_mat, bias_f32, *, tile_m, out_dtype,
                 allow_input_fusion=False):
    """patches: (M, K), w_mat: (K, E), bias_f32: (1, E) f32 -> (M, E)."""
    M, K = patches.shape
    E = w_mat.shape[1]

    # Fat M tiles amortize the ~0.35us fixed per-step pipeline overhead.
    # Clamp for tiny inputs; keep a multiple of 8 (sublane granularity).
    tile_m = int(max(8, min(tile_m, _round_up(M, 8))))
    tile_m = _round_up(tile_m, 8)
    grid_m = pl.cdiv(M, tile_m)   # ragged last block handled by OOB discard

    compiler_params = pltpu.CompilerParams(
        dimension_semantics=("parallel",),
        allow_input_fusion=([True, False, False] if allow_input_fusion
                            else None),
    )

    return pl.pallas_call(
        _proj_kernel,
        out_shape=jax.ShapeDtypeStruct((M, E), out_dtype),
        grid=(grid_m,),
        in_specs=[
            pl.BlockSpec((tile_m, K), lambda i: (i, 0)),   # patch rows
            pl.BlockSpec((K, E), lambda i: (0, 0)),        # weight (resident)
            pl.BlockSpec((1, E), lambda i: (0, 0)),        # bias (resident)
        ],
        out_specs=pl.BlockSpec((tile_m, E), lambda i: (i, 0)),
        compiler_params=compiler_params,
    )(patches, w_mat, bias_f32)


@functools.partial(
    jax.jit,
    static_argnames=("patch_size", "tile_m", "compute_dtype", "out_dtype",
                     "allow_input_fusion"))
def patch_embed_forward(x, weight, bias, *, patch_size=4, tile_m=4096,
                        compute_dtype=None, out_dtype=None,
                        allow_input_fusion=False):
    """
    x:      (B, C, H, W)          NCHW, like PyTorch
    weight: (embed_dim, C, p, p)  Conv2d (OIHW) weight
    bias:   (embed_dim,)
    compute_dtype: optional matmul input dtype (e.g. jnp.bfloat16); the MXU
                   accumulation stays float32.
    out_dtype:     optional token dtype (e.g. jnp.bfloat16); defaults to
                   x.dtype.  The output is the dominant HBM stream, so bf16
                   halves the biggest write.
    returns (tokens (B, Hp*Wp, embed_dim), Hp, Wp)
    """
    B, C, H, W = x.shape
    p = patch_size
    E = weight.shape[0]
    if out_dtype is None:
        out_dtype = x.dtype

    # Narrow the image *before* the pad/patchify so the XLA rearrangement and
    # the kernel's input DMA both move half the bytes.
    if compute_dtype is not None:
        x = x.astype(compute_dtype)
        weight = weight.astype(compute_dtype)

    # F.pad with zeros on right/bottom so H, W divide the patch size.
    pad_h = (-H) % p
    pad_w = (-W) % p
    if pad_h or pad_w:
        x = jnp.pad(x, ((0, 0), (0, 0), (0, pad_h), (0, pad_w)))
    Hp = (H + pad_h) // p
    Wp = (W + pad_w) // p

    # Patchify: (B, C, Hp, p, Wp, p) -> (B, Hp, Wp, C, p, p) -> (M, C*p*p).
    # TODO(synk): fuse this rearrangement into the kernel (do it in VMEM) to
    # save one image-sized HBM round trip; the rank-5 relayout it needs is not
    # reliably lowerable in Mosaic today, so it stays as XLA glue.
    xr = x.reshape(B, C, Hp, p, Wp, p)
    xr = xr.transpose(0, 2, 4, 1, 3, 5)
    patches = xr.reshape(B * Hp * Wp, C * p * p)

    K = C * p * p
    w_mat = weight.reshape(E, K).T                    # (K, E), (c,kh,kw) order
    bias2d = bias.astype(jnp.float32).reshape(1, E)   # pre-cast, resident

    out = _proj_matmul(patches, w_mat, bias2d, tile_m=tile_m,
                       out_dtype=out_dtype,
                       allow_input_fusion=allow_input_fusion)   # (M, E)

    tokens = out.reshape(B, Hp * Wp, E)   # == conv.flatten(2).transpose(1, 2)
    # norm_layer=None -> Identity (no-op).
    return tokens, Hp, Wp


if __name__ == "__main__":
    key = jax.random.PRNGKey(0)
    k_x, k_w, k_b = jax.random.split(key, 3)

    B, C, H, W = 2, 3, 18, 18          # non-divisible H/W exercises the pad path
    patch_size = 4
    embed_dim = 32                     # E not a multiple of 128: unpadded path

    x = jax.random.normal(k_x, (B, C, H, W), dtype=jnp.float32)
    weight = jax.random.normal(k_w, (embed_dim, C, patch_size, patch_size),
                               dtype=jnp.float32) * 0.02
    bias = jax.random.normal(k_b, (embed_dim,), dtype=jnp.float32) * 0.02

    # f32 path (exact reference check); M=50 also exercises the ragged tile.
    tokens, Hp, Wp = patch_embed_forward(x, weight, bias, patch_size=patch_size)
    tokens = jax.block_until_ready(tokens)
    Hp_i, Wp_i = int(Hp), int(Wp)

    # Reference: same math as nn.Conv2d(stride=kernel) after F.pad.
    x_pad = jnp.pad(x, ((0, 0), (0, 0),
                        (0, (-H) % patch_size), (0, (-W) % patch_size)))
    ref = jax.lax.conv_general_dilated(
        x_pad, weight, window_strides=(patch_size, patch_size), padding="VALID",
        dimension_numbers=("NCHW", "OIHW", "NCHW"))
    ref = ref + bias.reshape(1, embed_dim, 1, 1)
    ref = ref.reshape(B, embed_dim, Hp_i * Wp_i).transpose(0, 2, 1)

    assert tokens.shape == (B, Hp_i * Wp_i, embed_dim)
    assert jnp.allclose(tokens, ref, atol=1e-4, rtol=1e-4)

    # bf16 compute + bf16 tokens (halves both dominant HBM streams; the MXU
    # accumulation stays f32), loose tolerance.
    tok_bf16, _, _ = patch_embed_forward(
        x, weight, bias, patch_size=patch_size,
        compute_dtype=jnp.bfloat16, out_dtype=jnp.bfloat16)
    tok_bf16 = jax.block_until_ready(tok_bf16)
    assert tok_bf16.dtype == jnp.bfloat16
    assert tok_bf16.shape == (B, Hp_i * Wp_i, embed_dim)
    assert jnp.allclose(tok_bf16.astype(jnp.float32), ref, atol=5e-2, rtol=5e-2)

    print("KERNEL_OK")
</pallas_src>

<mosaic_0001>
module attributes {stable_mosaic.version = 11 : i64} {
  func.func @_proj_kernel(%arg0: i32, %arg1: memref<56x48xf32, #tpu.memory_space<vmem>>, %arg2: memref<48x32xf32, #tpu.memory_space<vmem>>, %arg3: memref<1x32xf32, #tpu.memory_space<vmem>>, %arg4: memref<56x32xf32, #tpu.memory_space<vmem>>) attributes {dimension_semantics = [#tpu.dimension_semantics<parallel>], iteration_bounds = array<i64: 1>, scalar_prefetch = 0 : i64, scratch_operands = 0 : i64, tpu.core_type = #tpu.core_type<tc>, window_params = [{transform_indices = @transform_0, window_bounds = array<i64: 56, 48>}, {pipeline_mode = #tpu.pipeline_mode<synchronous>, transform_indices = @transform_1, window_bounds = array<i64: 48, 32>}, {pipeline_mode = #tpu.pipeline_mode<synchronous>, transform_indices = @transform_2, window_bounds = array<i64: 1, 32>}, {transform_indices = @transform_3, window_bounds = array<i64: 56, 32>}]} {
    %c0 = arith.constant 0 : index
    %c0_0 = arith.constant 0 : index
    %0 = vector.load %arg1[%c0, %c0_0] : memref<56x48xf32, #tpu.memory_space<vmem>>, vector<56x48xf32>
    %c0_1 = arith.constant 0 : index
    %c0_2 = arith.constant 0 : index
    %1 = vector.load %arg2[%c0_1, %c0_2] : memref<48x32xf32, #tpu.memory_space<vmem>>, vector<48x32xf32>
    %cst = arith.constant dense<0.000000e+00> : vector<56x32xf32>
    %2 = tpu.matmul %0, %1, %cst {dimension_numbers = #tpu.dot_dimension_numbers<[1], [0], [0], [1], [0, 0, 1, 1], [], []>} : vector<56x48xf32>, vector<48x32xf32>, vector<56x32xf32> -> vector<56x32xf32>
    %c0_3 = arith.constant 0 : index
    %c0_4 = arith.constant 0 : index
    %3 = vector.load %arg3[%c0_3, %c0_4] : memref<1x32xf32, #tpu.memory_space<vmem>>, vector<1x32xf32>
    %4 = vector.broadcast %3 : vector<1x32xf32> to vector<56x32xf32>
    %5 = arith.addf %2, %4 : vector<56x32xf32>
    %c0_5 = arith.constant 0 : index
    %c0_6 = arith.constant 0 : index
    %6 = vector.load %arg4[%c0_5, %c0_6] : memref<56x32xf32, #tpu.memory_space<vmem>>, vector<56x32xf32>
    tpu.vector_store %arg4[%c0_5, %c0_6], %5 {strides = array<i32>} : memref<56x32xf32, #tpu.memory_space<vmem>>, vector<56x32xf32>,
    return
  }
  func.func @transform_0(%arg0: i32) -> (i32, i32) {
    %c0_i32 = arith.constant 0 : i32
    %c0_i32_0 = arith.constant 0 : i32
    return %arg0, %c0_i32 : i32, i32
  }
  func.func @transform_1(%arg0: i32) -> (i32, i32) {
    %c0_i32 = arith.constant 0 : i32
    %c0_i32_0 = arith.constant 0 : i32
    %c0_i32_1 = arith.constant 0 : i32
    return %c0_i32, %c0_i32_0 : i32, i32
  }
  func.func @transform_2(%arg0: i32) -> (i32, i32) {
    %c0_i32 = arith.constant 0 : i32
    %c0_i32_0 = arith.constant 0 : i32
    %c0_i32_1 = arith.constant 0 : i32
    return %c0_i32, %c0_i32_0 : i32, i32
  }
  func.func @transform_3(%arg0: i32) -> (i32, i32) {
    %c0_i32 = arith.constant 0 : i32
    %c0_i32_0 = arith.constant 0 : i32
    return %arg0, %c0_i32 : i32, i32
  }
}

</mosaic_0001>

<bundles_post_ra>
// kernel: patch_embed_forward.1
= control target key start
LH: loop header
LB: loop body
LE: loop exit
PB: predicated region body
PF: predicated region fallthrough
CT: control target
= control target key end

     0   :  { %v240_v0 = vmov 0.0|0.0   ;;  %vm241_vm0 = vmmov 0   ;;  %v242_v6 = vmov 0.0   ;;  %vm34_vm1 = vcmask 392192   ;;  %s347_s1 = inlined_call_operand.vmem [shape: f32[48,32], index: 1, kind: input, shape index: {}]   ;;  %s348_s0 = inlined_call_operand.vmem [shape: f32[50,48], index: 0, kind: input, shape index: {}]   ;;  %s349_s2 = inlined_call_operand.vmem [shape: f32[1,32], index: 2, kind: input, shape index: {}]   ;;  %s350_s3 = inlined_call_operand.vmem [shape: f32[50,32], index: 3, kind: output, shape index: {}]  }
   0x1   :  { %222 = vmatprep.subr.bf16.mxu0 %v240_v0  ;;  %v21_v1 = vld [vmem:[%s347_s1] sm:$0xff]  ;;  %v22_v2 = vld [vmem:[%s347_s1 + $0x8] sm:$0xff]  ;;  %231 = vmatprep.subr.bf16.mxu1 %v240_v0  ;;  %v23_v3 = vld [vmem:[%s347_s1 + $0x10] sm:$0xff]  ;;  %vm156_vm2 = vcmask 261120  }
   0x2   :  { %v223_v4 = vpack.c.bf16 %v22_v2, %v21_v1  ;;  %v24_v5 = vld [vmem:[%s347_s1 + $0x18] sm:$0xff]  ;;  %201 = vmatprep.mubr.msk.f32.mxu0 %vm241_vm0, %v242_v6  ;;  %213 = vmatprep.mubr.msk.f32.mxu1 %vm241_vm0, %v242_v6  ;;  %v25_v8 = vld [vmem:[%s347_s1 + $0x20] sm:$0xff]  ;;  %v26_v9 = vld [vmem:[%s347_s1 + $0x28] sm:$0xff] }
   0x3   :  { %v226_v7 = vpack.c.bf16 %v24_v5, %v23_v3  ;;  %v229_v10 = vpack.c.bf16 %v26_v9, %v25_v8  ;;  %v14_v11 = vld [vmem:[%s348_s0] sm:$0xff]  ;;  %v15_v13 = vld [vmem:[%s348_s0 + $0x8] sm:$0xff]  ;;  %v16_v15 = vld [vmem:[%s348_s0 + $0x10] sm:$0xff] }
   0x4   :  { %224 = vmatpush3.bf16.msra.mxu0 %v223_v4  ;;  %234 = vmatpush3.bf16.msra.mxu1 %v223_v4  ;;  %v18_v12 = vld [vmem:[%s348_s0 + $0x20] sm:$0xff]  ;;  %v19_v14 = vld [vmem:[%s348_s0 + $0x28] sm:$0xff]  ;;  %v20_v16 = vld [vmem:[%s348_s0 + $0x30] sm:$0xff] }
   0x5   :  { %225 = vmatprep.subr.bf16.mxu0 %v240_v0  ;;  %232 = vmatprep.subr.bf16.mxu1 %v240_v0  ;;  %v17_v17 = vld [vmem:[%s348_s0 + $0x18] sm:$0xff]  ;;  %v168_v18 = vld [vmem:[%s349_s2] ss:$0 sm:$0xff] }
   0x8   :  { %227 = vmatpush3.bf16.msra.mxu0 %v226_v7  ;;  %235 = vmatpush3.bf16.msra.mxu1 %v226_v7 }
   0x9   :  { %228 = vmatprep.subr.bf16.mxu0 %v240_v0  ;;  %233 = vmatprep.subr.bf16.mxu1 %v240_v0 }
   0xc   :  { %230 = vmatpush3.bf16.msra.mxu0 %v229_v10  ;;  %236 = vmatpush3.bf16.msra.mxu1 %v229_v10 }
   0xf   :  { %202 = vmatmul.mubr.msk.f32.vlgmr.msra.gmra.mrb[0].mxu0 %vm34_vm1, %v14_v11  ;;  %214 = vmatmul.mubr.msk.f32.vlgmr.msra.gmra.mrb[0].mxu1 %vm34_vm1, %v18_v12 }
  0x10   :  { %204 = vmatprep.mubr.msk.f32.mxu0 %vm241_vm0, %v242_v6  ;;  %216 = vmatprep.mubr.msk.f32.mxu1 %vm241_vm0, %v242_v6 }
  0x13   :  { %205 = vmatmul.mubr.msk.f32.gmra.mrb[2].mxu0 %vm34_vm1, %v15_v13  ;;  %217 = vmatmul.mubr.msk.f32.gmra.mrb[2].mxu1 %vm34_vm1, %v19_v14 }
  0x14   :  { %207 = vmatprep.mubr.msk.f32.mxu0 %vm241_vm0, %v242_v6  ;;  %219 = vmatprep.mubr.msk.f32.mxu1 %vm241_vm0, %v242_v6 }
  0x17   :  { %208 = vmatmul.mubr.msk.f32.gmra.mrb[4].mxu0 %vm34_vm1, %v16_v15  ;;  %220 = vmatmul.mubr.msk.f32.gmra.mrb[4].mxu1 %vm34_vm1, %v20_v16 }
  0x18   :  { %210 = vmatprep.mubr.msk.f32.mxu0 %vm241_vm0, %v242_v6 }
  0x1b   :  { %211 = vmatmul.mubr.msk.f32.gmra.mrb[6].mxu0 %vm34_vm1, %v17_v17 }
  0xe2   :  { %v122_v19 = vpop.f32.mrb[0].mxu0  ;;  %v142_v20 = vpop.f32.mrb[0].mxu1 }
  0xe3   :  { %v123_v21 = vadd.f32 %v168_v18, %v122_v19  ;;  %v203_v22 = vpop.f32.mrb[1].mxu0  ;;  %v143_v23 = vadd.f32 %v168_v18, %v142_v20  ;;  %v215_v24 = vpop.f32.mrb[1].mxu1 }
  0xe5   :  { %157 = vst.msk [vmem:[%s350_s3] sm:$0xff] %vm156_vm2, %v123_v21  ;;  %161 = vst.msk [vmem:[%s350_s3 + $0x20] sm:$0xff] %vm156_vm2, %v143_v23 }
  0xe6   :  { %v127_v25 = vpop.f32.mrb[2].mxu0  ;;  %v147_v26 = vpop.f32.mrb[2].mxu1 }
  0xe7   :  { %v128_v27 = vadd.f32 %v168_v18, %v127_v25  ;;  %v206_v28 = vpop.f32.mrb[3].mxu0  ;;  %v148_v29 = vadd.f32 %v168_v18, %v147_v26  ;;  %v218_v30 = vpop.f32.mrb[3].mxu1 }
  0xe9   :  { %158 = vst.msk [vmem:[%s350_s3 + $0x8] sm:$0xff] %vm156_vm2, %v128_v27  ;;  %162 = vst.msk [vmem:[%s350_s3 + $0x28] sm:$0xff] %vm156_vm2, %v148_v29 }
  0xea   :  { %v132_v31 = vpop.f32.mrb[4].mxu0  ;;  %v152_v32 = vpop.f32.mrb[4].mxu1 }
  0xeb   :  { %v133_v33 = vadd.f32 %v168_v18, %v132_v31  ;;  %v209_v34 = vpop.f32.mrb[5].mxu0  ;;  %v153_v35 = vadd.f32 %v168_v18, %v152_v32  ;;  %v221_v36 = vpop.f32.mrb[5].mxu1 }
  0xed   :  { %159 = vst.msk [vmem:[%s350_s3 + $0x10] sm:$0xff] %vm156_vm2, %v133_v33  ;;  %163 = vst.msk [vmem:[%s350_s3 + $0x30] sm:$0xff] %vm156_vm2, %v153_v35 }
  0xee   :  { %v137_v37 = vpop.f32.mrb[6].mxu0 }
  0xef   :  { %v138_v38 = vadd.f32 %v168_v18, %v137_v37  ;;  %v212_v39 = vpop.f32.mrb[7].mxu0 }
  0xf1   :  { %160 = vst.msk [vmem:[%s350_s3 + $0x18] sm:$0xff] %vm156_vm2, %v138_v38 }

</bundles_post_ra>
